<compile_context>
chip_gen: v6e
topology: v6e:2x2x1
jax: 0.10.0
libtpu: 0.0.40
codegen_flags: <defaults>
</compile_context>

<pallas_src>
import jax
import jax.numpy as jnp
from jax.experimental import pallas as pl
from jax.experimental.pallas import tpu as pltpu

_LANE = 128
_SUBLANE = 8


def _round_up(n, m):
    return ((n + m - 1) // m) * m


def _qnet_kernel(x_ref,
                 w1_ref, b1_ref,
                 w2_ref, b2_ref,
                 w5_ref, b5_ref,
                 w6_ref, b6_ref,
                 o_ref):
    """Whole MLP hot path: 4 bf16 MXU matmuls (f32 acc) + f32 bias/ReLU (VPU)."""
    # In-kernel bf16 cast (VPU work hidden under MXU/DMA slack) replaces the
    # former wrapper-side pad+cast HBM pass.
    x = x_ref[...].astype(jnp.bfloat16)  # [TB, state_size]

    h = jnp.dot(x, w1_ref[...], preferred_element_type=jnp.float32) + b1_ref[...]
    h = jnp.maximum(h, 0.0).astype(jnp.bfloat16)

    h = jnp.dot(h, w2_ref[...], preferred_element_type=jnp.float32) + b2_ref[...]
    h = jnp.maximum(h, 0.0).astype(jnp.bfloat16)

    h = jnp.dot(h, w5_ref[...], preferred_element_type=jnp.float32) + b5_ref[...]
    h = jnp.maximum(h, 0.0).astype(jnp.bfloat16)

    out = jnp.dot(h, w6_ref[...], preferred_element_type=jnp.float32) + b6_ref[...]
    # bf16 writeback: halves the largest HBM stream of this mem-bound kernel.
    o_ref[...] = out.astype(o_ref.dtype)


def init_params(key, state_size, action_size):
    """Deterministic init mirroring nn.Linear (uniform +-1/sqrt(fan_in)).
    Weights stored as [in, out] (transposed vs PyTorch's [out, in]), f32."""
    dims = [(state_size, 128), (128, 256), (256, 128), (128, action_size)]
    names = ["1", "2", "5", "6"]
    params = {}
    for (fan_in, fan_out), name in zip(dims, names):
        key, kw, kb = jax.random.split(key, 3)
        bound = 1.0 / (fan_in ** 0.5)
        params[f"w{name}"] = jax.random.uniform(
            kw, (fan_in, fan_out), jnp.float32, minval=-bound, maxval=bound)
        params[f"b{name}"] = jax.random.uniform(
            kb, (1, fan_out), jnp.float32, minval=-bound, maxval=bound)
    return params


def prepare_params(params, state_size, action_size):
    """One-time prep (outside the hot path): cast weights to bf16 [in, out].
    Only the final layer's output dim is zero-padded to a 128-lane multiple so
    the kernel's store stays lane-dense.  Biases stay f32 (bias + ReLU run in
    f32 on the VPU).  The ragged K=state_size dim is left as-is; Mosaic pads it
    internally at negligible cost."""
    a_pad = _round_up(action_size, _LANE)
    w6 = jnp.zeros((128, a_pad), jnp.float32).at[:, :action_size].set(params["w6"])
    b6 = jnp.zeros((1, a_pad), jnp.float32).at[:, :action_size].set(params["b6"])
    return {
        "w1": params["w1"].astype(jnp.bfloat16), "b1": params["b1"],
        "w2": params["w2"].astype(jnp.bfloat16), "b2": params["b2"],
        "w5": params["w5"].astype(jnp.bfloat16), "b5": params["b5"],
        "w6": w6.astype(jnp.bfloat16), "b6": b6,
    }


def qnetwork_forward(x, prepared, state_size, action_size, *, tb=512):
    """x: [B, state_size] f32. prepared: output of prepare_params.
    Returns [B, action_size] f32."""
    B = x.shape[0]
    a_pad = prepared["w6"].shape[1]

    # Batch tile: multiple of 8 (sublane), clamped to the batch, default 512
    # (~85%+ of HBM roofline per measured Pallas tiling data).  If that would
    # leave a single grid step, split into >= 2 tiles so v7x's two TensorCores
    # both get work via dimension_semantics=("parallel",).
    tb = max(_SUBLANE, _round_up(min(tb, B), _SUBLANE))
    if B > _SUBLANE and _round_up(B, tb) // tb < 2:
        tb = max(_SUBLANE, _round_up((B + 1) // 2, _SUBLANE))
    b_pad = _round_up(B, tb)

    # Pad batch rows only when B is not already a tile multiple (zero rows; their
    # outputs are stripped below).  No feature-dim pad / cast HBM round trip.
    x_in = x if b_pad == B else jnp.pad(x, ((0, b_pad - B), (0, 0)))

    grid = (b_pad // tb,)

    def _const(shape):
        # Constant index_map -> weights/biases stay VMEM-resident across steps.
        return pl.BlockSpec(shape, lambda i: (0, 0))

    in_specs = [
        # Activation tile, double-buffered against the 4 matmuls.
        # TODO(synk): on v5e, pipeline_mode=pl.Buffered(3) here hides DMA jitter.
        pl.BlockSpec((tb, state_size), lambda i: (i, 0)),
        _const(prepared["w1"].shape), _const(prepared["b1"].shape),
        _const(prepared["w2"].shape), _const(prepared["b2"].shape),
        _const(prepared["w5"].shape), _const(prepared["b5"].shape),
        _const(prepared["w6"].shape), _const(prepared["b6"].shape),
    ]
    out_spec = pl.BlockSpec((tb, a_pad), lambda i: (i, 0))  # lane-dense bf16 tile

    flops = 2 * b_pad * (state_size * 128 + 128 * 256 + 256 * 128 + 128 * a_pad)
    weight_bytes = sum(int(v.size) * v.dtype.itemsize for v in prepared.values())
    bytes_accessed = b_pad * state_size * 4 + weight_bytes + b_pad * a_pad * 2

    out = pl.pallas_call(
        _qnet_kernel,
        out_shape=jax.ShapeDtypeStruct((b_pad, a_pad), jnp.bfloat16),
        grid=grid,
        in_specs=in_specs,
        out_specs=out_spec,
        compiler_params=pltpu.CompilerParams(
            dimension_semantics=("parallel",),   # batch tiles shard across TCs on v7x
        ),
        cost_estimate=pl.CostEstimate(
            flops=flops, transcendentals=0, bytes_accessed=bytes_accessed),
    )(x_in,
      prepared["w1"], prepared["b1"],
      prepared["w2"], prepared["b2"],
      prepared["w5"], prepared["b5"],
      prepared["w6"], prepared["b6"])

    # Tiny post-kernel slice + deferred f32 upcast.
    return out[:B, :action_size].astype(jnp.float32)


def reference_forward(x, p):
    """Pure f32 JAX reference using the original (un-padded, f32) params."""
    h = jnp.maximum(x @ p["w1"] + p["b1"], 0.0)
    h = jnp.maximum(h @ p["w2"] + p["b2"], 0.0)
    h = jnp.maximum(h @ p["w5"] + p["b5"], 0.0)
    return h @ p["w6"] + p["b6"]


if __name__ == "__main__":
    key = jax.random.PRNGKey(0)
    k_params, k_x = jax.random.split(key)

    batch = 64          # small demo batch; the tile logic splits it into 2 grid steps
    state_size = 64     # small synthetic state dim (K padded internally by Mosaic)
    action_size = 64    # small synthetic action dim (padded to 128 lanes internally)

    params = init_params(k_params, state_size, action_size)
    prepared = prepare_params(params, state_size, action_size)
    x = jax.random.normal(k_x, (batch, state_size), jnp.float32)

    out = qnetwork_forward(x, prepared, state_size, action_size)
    out = jax.block_until_ready(out)

    ref = reference_forward(x, params)
    assert out.shape == (batch, action_size)
    # bf16 weights/activations/output on the MXU (f32 accumulation) -> loosened tolerance.
    assert jnp.allclose(out, ref, atol=5e-2, rtol=5e-2), "mismatch vs JAX reference"

    print("KERNEL_OK")
</pallas_src>

<mosaic_0001>
module attributes {stable_mosaic.version = 11 : i64} {
  func.func @_qnet_kernel(%arg0: i32, %arg1: memref<32x64xf32, #tpu.memory_space<vmem>>, %arg2: memref<64x128xbf16, #tpu.memory_space<vmem>>, %arg3: memref<1x128xf32, #tpu.memory_space<vmem>>, %arg4: memref<128x256xbf16, #tpu.memory_space<vmem>>, %arg5: memref<1x256xf32, #tpu.memory_space<vmem>>, %arg6: memref<256x128xbf16, #tpu.memory_space<vmem>>, %arg7: memref<1x128xf32, #tpu.memory_space<vmem>>, %arg8: memref<128x128xbf16, #tpu.memory_space<vmem>>, %arg9: memref<1x128xf32, #tpu.memory_space<vmem>>, %arg10: memref<32x128xbf16, #tpu.memory_space<vmem>>) attributes {dimension_semantics = [#tpu.dimension_semantics<parallel>], iteration_bounds = array<i64: 2>, scalar_prefetch = 0 : i64, scratch_operands = 0 : i64, tpu.core_type = #tpu.core_type<tc>, window_params = [{transform_indices = @transform_0, window_bounds = array<i64: 32, 64>}, {pipeline_mode = #tpu.pipeline_mode<synchronous>, transform_indices = @transform_1, window_bounds = array<i64: 64, 128>}, {pipeline_mode = #tpu.pipeline_mode<synchronous>, transform_indices = @transform_2, window_bounds = array<i64: 1, 128>}, {pipeline_mode = #tpu.pipeline_mode<synchronous>, transform_indices = @transform_3, window_bounds = array<i64: 128, 256>}, {pipeline_mode = #tpu.pipeline_mode<synchronous>, transform_indices = @transform_4, window_bounds = array<i64: 1, 256>}, {pipeline_mode = #tpu.pipeline_mode<synchronous>, transform_indices = @transform_5, window_bounds = array<i64: 256, 128>}, {pipeline_mode = #tpu.pipeline_mode<synchronous>, transform_indices = @transform_6, window_bounds = array<i64: 1, 128>}, {pipeline_mode = #tpu.pipeline_mode<synchronous>, transform_indices = @transform_7, window_bounds = array<i64: 128, 128>}, {pipeline_mode = #tpu.pipeline_mode<synchronous>, transform_indices = @transform_8, window_bounds = array<i64: 1, 128>}, {transform_indices = @transform_9, window_bounds = array<i64: 32, 128>}]} {
    %c0 = arith.constant 0 : index
    %c0_0 = arith.constant 0 : index
    %0 = vector.load %arg1[%c0, %c0_0] : memref<32x64xf32, #tpu.memory_space<vmem>>, vector<32x64xf32>
    %1 = arith.truncf %0 : vector<32x64xf32> to vector<32x64xbf16>
    %c0_1 = arith.constant 0 : index
    %c0_2 = arith.constant 0 : index
    %2 = vector.load %arg2[%c0_1, %c0_2] : memref<64x128xbf16, #tpu.memory_space<vmem>>, vector<64x128xbf16>
    %cst = arith.constant dense<0.000000e+00> : vector<32x128xf32>
    %3 = tpu.matmul %1, %2, %cst {dimension_numbers = #tpu.dot_dimension_numbers<[1], [0], [0], [1], [0, 0, 1, 1], [], []>} : vector<32x64xbf16>, vector<64x128xbf16>, vector<32x128xf32> -> vector<32x128xf32>
    %c0_3 = arith.constant 0 : index
    %c0_4 = arith.constant 0 : index
    %4 = vector.load %arg3[%c0_3, %c0_4] : memref<1x128xf32, #tpu.memory_space<vmem>>, vector<1x128xf32>
    %5 = vector.broadcast %4 : vector<1x128xf32> to vector<32x128xf32>
    %6 = arith.addf %3, %5 : vector<32x128xf32>
    %cst_5 = arith.constant 0.000000e+00 : f32
    %7 = vector.broadcast %cst_5 : f32 to vector<32x128xf32>
    %8 = arith.maximumf %6, %7 : vector<32x128xf32>
    %9 = arith.truncf %8 : vector<32x128xf32> to vector<32x128xbf16>
    %c0_6 = arith.constant 0 : index
    %c0_7 = arith.constant 0 : index
    %10 = vector.load %arg4[%c0_6, %c0_7] : memref<128x256xbf16, #tpu.memory_space<vmem>>, vector<128x256xbf16>
    %cst_8 = arith.constant dense<0.000000e+00> : vector<32x256xf32>
    %11 = tpu.matmul %9, %10, %cst_8 {dimension_numbers = #tpu.dot_dimension_numbers<[1], [0], [0], [1], [0, 0, 1, 1], [], []>} : vector<32x128xbf16>, vector<128x256xbf16>, vector<32x256xf32> -> vector<32x256xf32>
    %c0_9 = arith.constant 0 : index
    %c0_10 = arith.constant 0 : index
    %12 = vector.load %arg5[%c0_9, %c0_10] : memref<1x256xf32, #tpu.memory_space<vmem>>, vector<1x256xf32>
    %13 = vector.broadcast %12 : vector<1x256xf32> to vector<32x256xf32>
    %14 = arith.addf %11, %13 : vector<32x256xf32>
    %cst_11 = arith.constant 0.000000e+00 : f32
    %15 = vector.broadcast %cst_11 : f32 to vector<32x256xf32>
    %16 = arith.maximumf %14, %15 : vector<32x256xf32>
    %17 = arith.truncf %16 : vector<32x256xf32> to vector<32x256xbf16>
    %c0_12 = arith.constant 0 : index
    %c0_13 = arith.constant 0 : index
    %18 = vector.load %arg6[%c0_12, %c0_13] : memref<256x128xbf16, #tpu.memory_space<vmem>>, vector<256x128xbf16>
    %cst_14 = arith.constant dense<0.000000e+00> : vector<32x128xf32>
    %19 = tpu.matmul %17, %18, %cst_14 {dimension_numbers = #tpu.dot_dimension_numbers<[1], [0], [0], [1], [0, 0, 1, 1], [], []>} : vector<32x256xbf16>, vector<256x128xbf16>, vector<32x128xf32> -> vector<32x128xf32>
    %c0_15 = arith.constant 0 : index
    %c0_16 = arith.constant 0 : index
    %20 = vector.load %arg7[%c0_15, %c0_16] : memref<1x128xf32, #tpu.memory_space<vmem>>, vector<1x128xf32>
    %21 = vector.broadcast %20 : vector<1x128xf32> to vector<32x128xf32>
    %22 = arith.addf %19, %21 : vector<32x128xf32>
    %cst_17 = arith.constant 0.000000e+00 : f32
    %23 = vector.broadcast %cst_17 : f32 to vector<32x128xf32>
    %24 = arith.maximumf %22, %23 : vector<32x128xf32>
    %25 = arith.truncf %24 : vector<32x128xf32> to vector<32x128xbf16>
    %c0_18 = arith.constant 0 : index
    %c0_19 = arith.constant 0 : index
    %26 = vector.load %arg8[%c0_18, %c0_19] : memref<128x128xbf16, #tpu.memory_space<vmem>>, vector<128x128xbf16>
    %cst_20 = arith.constant dense<0.000000e+00> : vector<32x128xf32>
    %27 = tpu.matmul %25, %26, %cst_20 {dimension_numbers = #tpu.dot_dimension_numbers<[1], [0], [0], [1], [0, 0, 1, 1], [], []>} : vector<32x128xbf16>, vector<128x128xbf16>, vector<32x128xf32> -> vector<32x128xf32>
    %c0_21 = arith.constant 0 : index
    %c0_22 = arith.constant 0 : index
    %28 = vector.load %arg9[%c0_21, %c0_22] : memref<1x128xf32, #tpu.memory_space<vmem>>, vector<1x128xf32>
    %29 = vector.broadcast %28 : vector<1x128xf32> to vector<32x128xf32>
    %30 = arith.addf %27, %29 : vector<32x128xf32>
    %31 = arith.truncf %30 : vector<32x128xf32> to vector<32x128xbf16>
    %c0_23 = arith.constant 0 : index
    %c0_24 = arith.constant 0 : index
    %32 = vector.load %arg10[%c0_23, %c0_24] : memref<32x128xbf16, #tpu.memory_space<vmem>>, vector<32x128xbf16>
    tpu.vector_store %arg10[%c0_23, %c0_24], %31 {strides = array<i32>} : memref<32x128xbf16, #tpu.memory_space<vmem>>, vector<32x128xbf16>,
    return
  }
  func.func @transform_0(%arg0: i32) -> (i32, i32) {
    %c0_i32 = arith.constant 0 : i32
    %c0_i32_0 = arith.constant 0 : i32
    return %arg0, %c0_i32 : i32, i32
  }
  func.func @transform_1(%arg0: i32) -> (i32, i32) {
    %c0_i32 = arith.constant 0 : i32
    %c0_i32_0 = arith.constant 0 : i32
    %c0_i32_1 = arith.constant 0 : i32
    return %c0_i32, %c0_i32_0 : i32, i32
  }
  func.func @transform_2(%arg0: i32) -> (i32, i32) {
    %c0_i32 = arith.constant 0 : i32
    %c0_i32_0 = arith.constant 0 : i32
    %c0_i32_1 = arith.constant 0 : i32
    return %c0_i32, %c0_i32_0 : i32, i32
  }
  func.func @transform_3(%arg0: i32) -> (i32, i32) {
    %c0_i32 = arith.constant 0 : i32
    %c0_i32_0 = arith.constant 0 : i32
    %c0_i32_1 = arith.constant 0 : i32
    return %c0_i32, %c0_i32_0 : i32, i32
  }
  func.func @transform_4(%arg0: i32) -> (i32, i32) {
    %c0_i32 = arith.constant 0 : i32
    %c0_i32_0 = arith.constant 0 : i32
    %c0_i32_1 = arith.constant 0 : i32
    return %c0_i32, %c0_i32_0 : i32, i32
  }
  func.func @transform_5(%arg0: i32) -> (i32, i32) {
    %c0_i32 = arith.constant 0 : i32
    %c0_i32_0 = arith.constant 0 : i32
    %c0_i32_1 = arith.constant 0 : i32
    return %c0_i32, %c0_i32_0 : i32, i32
  }
  func.func @transform_6(%arg0: i32) -> (i32, i32) {
    %c0_i32 = arith.constant 0 : i32
    %c0_i32_0 = arith.constant 0 : i32
    %c0_i32_1 = arith.constant 0 : i32
    return %c0_i32, %c0_i32_0 : i32, i32
  }
  func.func @transform_7(%arg0: i32) -> (i32, i32) {
    %c0_i32 = arith.constant 0 : i32
    %c0_i32_0 = arith.constant 0 : i32
    %c0_i32_1 = arith.constant 0 : i32
    return %c0_i32, %c0_i32_0 : i32, i32
  }
  func.func @transform_8(%arg0: i32) -> (i32, i32) {
    %c0_i32 = arith.constant 0 : i32
    %c0_i32_0 = arith.constant 0 : i32
    %c0_i32_1 = arith.constant 0 : i32
    return %c0_i32, %c0_i32_0 : i32, i32
  }
  func.func @transform_9(%arg0: i32) -> (i32, i32) {
    %c0_i32 = arith.constant 0 : i32
    %c0_i32_0 = arith.constant 0 : i32
    return %arg0, %c0_i32 : i32, i32
  }
}

</mosaic_0001>

<bundles_post_ra>
// kernel: tpu_custom_call.1
= control target key start
LH: loop header
LB: loop body
LE: loop exit
PB: predicated region body
PF: predicated region fallthrough
CT: control target
= control target key end

     0   :  { %s1974_s0 = inlined_call_operand.hbm [shape: f32[64,64], index: 0, kind: input, shape index: {}]   ;;  %s1975_s1 = inlined_call_operand.hbm [shape: bf16[64,128], index: 1, kind: input, shape index: {}]   ;;  %s1976_s2 = inlined_call_operand.vmem [shape: f32[1,128], index: 2, kind: input, shape index: {}]   ;;  %s1977_s3 = inlined_call_operand.hbm [shape: bf16[128,256], index: 3, kind: input, shape index: {}]   ;;  %s1978_s4 = inlined_call_operand.vmem [shape: f32[1,256], index: 4, kind: input, shape index: {}]   ;;  %s1979_s5 = inlined_call_operand.hbm [shape: bf16[256,128], index: 5, kind: input, shape index: {}]   ;;  %s1980_s6 = inlined_call_operand.vmem [shape: f32[1,128], index: 6, kind: input, shape index: {}]   ;;  %s1981_s7 = inlined_call_operand.hbm [shape: bf16[128,128], index: 7, kind: input, shape index: {}]   ;;  %s1982_s8 = inlined_call_operand.vmem [shape: f32[1,128], index: 8, kind: input, shape index: {}]   ;;  %s1983_s9 = inlined_call_operand.hbm [shape: bf16[64,128], index: 9, kind: output, shape index: {}]  }
   0x1   :  { %1990 = sst [smem:[#allocation16_spill]] %s1975_s1 }
   0x2   :  { %1991 = sst [smem:[#allocation17_spill]] %s1977_s3 }
   0x3   :  { %1992 = sst [smem:[#allocation18_spill]] %s1979_s5 }
   0x4   :  { %14 = vsyncpa [#allocation3], 0 }
   0x5   :  { %16 = vsyncpa [#allocation3 + $0x1], 0 }
   0x6   :  { %17 = vsyncpa [#allocation6], 0 }
   0x7   :  { %18 = vsyncpa [#allocation9], 0 }
   0x8   :  { %19 = vsyncpa [#allocation4], 0 }
   0x9   :  { %21 = vsyncpa [#allocation4 + $0x1], 0  ;;  %s1730_s30 = smov 0   ;;  %s1732_s10 = smov 0  }
   0xa   :  { %s1734_s11 = smov 0   ;;  %s1736_s12 = smov 0  }
   0xb LB: > { %s1751_s13 = sadd.s32 4294967295, %s1665_s12   ;;  %s1147_s14 = sadd.s32 4294967294, %s1665_s12   ;;  %s1665_s12 = sphi %s1736_s12, %s2016_s12   ;;  %s1661_s11 = sphi %s1734_s11, %s2015_s11   ;;  %s1657_s10 = sphi %s1732_s10, %s2014_s10   ;;  %s1653_s30 = sphi %s1730_s30, %s2013_s30  }
   0xc   : > { %p47_p0 = scmp.ne.s32.totalorder %s1657_s10, %s1653_s30  ;;  %p1984_p1 = scmp.eq.s32.totalorder %s1751_s13, 0 }
   0xd   : > { %p239_p2 = scmp.eq.s32.totalorder %s1751_s13, 1  ;;  %p245_p3 = scmp.eq.s32.totalorder %s1147_s14, 1 }
   0xe   : > { %p1760_p4 = por %p1984_p1, %p47_p0  ;;  %p1148_p5 = scmp.ge.s32.totalorder %s1665_s12, 1 }
   0xf   : > { %p1765_p6 = por %p245_p3, %p47_p0  ;;  %p252_p7 = scmp.lt.s32.totalorder %s1665_s12, 3 }
  0x10   : > { %s1993_s15 = scalar_select %p1760_p4, 1, 0 }
  0x11   : > { %s1994_s16 = scalar_select %p1765_p6, 1, 0 }
  0x12   : > { %p1770_p8 = pnand %p1148_p5, %p252_p7  ;;  %s1667_s18 = smov [#allocation5]  }
  0x13   : > { %s264_s19 = sshll.u32 %s1667_s18, 4  ;;  %s1668_s21 = smov [#allocation8]   ;;  %s265_s19 = int_to_ptr.vmem [resolvable:$true] %s264_s19 }
  0x14   : > { %s1995_s17 = scalar_select %p1770_p8, 1, 0 }
  0x15   : > { %p1335_p9 = pneg %p1770_p8  ;;  %s296_s22 = sshll.u32 %s1668_s21, 4  ;;  %s297_s22 = int_to_ptr.vmem [resolvable:$true] %s296_s22 }
  0x16   : > { %s1669_s23 = smov [#allocation7]   ;;  %s1472_s25 = scalar_lea.vmem %s265_s19, 512 }
  0x17   : > { %p1779_p11 = pnand %p1335_p9, %p1984_p1  ;;  %s280_s24 = sshll.u32 %s1669_s23, 4  ;;  %s281_s24 = int_to_ptr.vmem [resolvable:$true] %s280_s24 }
  0x18   : > { %p1473_p13 = scmp.ne.s32.totalorder %s265_s19, %s1472_s25  ;;  %p1480_p5 = scmp.lt.s32.totalorder %s265_s19, %s265_s19 }
  0x19   : > { %p1463_p12 = pneg %p1779_p11  ;;  %p1481_p7 = scmp.lt.s32.totalorder %s1472_s25, %s1472_s25 }
  0x1b   : > { %p1475_p0 = pnand %p1473_p13, %p1463_p12  ;;  %p1482_p9 = por %p1481_p7, %p1480_p5 }
  0x1d   : > { %p1476_p3 = pneg %p1475_p0 }
  0x1f   : > { %p1483_p10 = pnand %p1482_p9, %p1476_p3 }
  0x21   : > { %1486 = shalt.err (!%p1483_p10)
}
  0x22   : > { %s1670_s26 = smov 64   ;;  %s1671_s27 = smov 4  }
  0x23   : > { %s1997_s1 = sld [smem:[#allocation16_spill]]  ;;  %s1498_s14 = scalar_lea.vmem %s297_s22, 2048 }
  0x24   : > { %p1499_p13 = scmp.ne.s32.totalorder %s297_s22, %s1498_s14  ;;  %p1506_p3 = scmp.lt.s32.totalorder %s297_s22, %s297_s22 }
  0x25   : > { %p1507_p10 = scmp.lt.s32.totalorder %s1498_s14, %s1498_s14 }
  0x26   : > { %p1501_p0 = pnand %p1499_p13, %p1463_p12 }
  0x27   : > { %p1508_p7 = por %p1507_p10, %p1506_p3 }
  0x28   : > { %p1502_p5 = pneg %p1501_p0 }
  0x29   : > { %1338 = dma.hbm_to_vmem [thread:$0]  (!%p1779_p11), %s1997_s1, 512, %s265_s19, [#allocation6], %s1670_s26, %s1670_s26, %s1671_s27  }
  0x2a   : > { %p1509_p9 = pnand %p1508_p7, %p1502_p5 }
  0x2c   : > { %1512 = shalt.err (!%p1509_p9)
}
  0x2d   : > { %s1998_s5 = sld [smem:[#allocation18_spill]]  ;;  %s1524_s19 = scalar_lea.vmem %s281_s24, 2048 }
  0x2e   : > { %p1525_p1 = scmp.ne.s32.totalorder %s281_s24, %s1524_s19  ;;  %p1532_p3 = scmp.lt.s32.totalorder %s281_s24, %s281_s24 }
  0x2f   : > { %p1533_p5 = scmp.lt.s32.totalorder %s1524_s19, %s1524_s19 }
  0x30   : > { %p1527_p13 = pnand %p1525_p1, %p1463_p12 }
  0x31   : > { %p1534_p10 = por %p1533_p5, %p1532_p3 }
  0x32   : > { %p1528_p0 = pneg %p1527_p13 }
  0x33   : > { %1344 = dma.hbm_to_vmem [thread:$0]  (!%p1779_p11), %s1998_s5, 2048, %s297_s22, [#allocation9], %s1670_s26, %s1670_s26, %s1671_s27  }
  0x34   : > { %p1535_p7 = pnand %p1534_p10, %p1528_p0 }
  0x36   : > { %1538 = shalt.err (!%p1535_p7)
}
  0x37   : > { %s1985_s23 = smov 128   ;;  %s1986_s25 = smov 8  }
  0x38   : > { %s1999_s3 = sld [smem:[#allocation17_spill]]  ;;  %s1674_s29 = smov [#allocation10]  }
  0x39   : > { %s312_s14 = sshll.u32 %s1674_s29, 4  ;;  %s313_s14 = int_to_ptr.vmem [resolvable:$true] %s312_s14 }
  0x3a   : > { %s1550_s18 = scalar_lea.vmem %s313_s14, 1024  ;;  %p1558_p0 = scmp.lt.s32.totalorder %s313_s14, %s313_s14 }
  0x3b   : > { %p1551_p1 = scmp.ne.s32.totalorder %s313_s14, %s1550_s18  ;;  %p1559_p3 = scmp.lt.s32.totalorder %s1550_s18, %s1550_s18 }
  0x3d   : > { %p1553_p9 = pnand %p1551_p1, %p1463_p12  ;;  %p1560_p5 = por %p1559_p3, %p1558_p0 }
  0x3e   : > { %1341 = dma.hbm_to_vmem [thread:$0]  (!%p1779_p11), %s1999_s3, 2048, %s281_s24, [#allocation6], %s1985_s23, %s1985_s23, %s1986_s25  }
  0x3f   : > { %p1554_p13 = pneg %p1553_p9 }
  0x41   : > { %p1561_p10 = pnand %p1560_p5, %p1554_p13 }
  0x43   : > { %1564 = shalt.err (!%p1561_p10)
}
  0x44   : > { %1347 = dma.hbm_to_vmem [thread:$0]  (!%p1779_p11), %s1981_s7, 1024, %s313_s14, [#allocation9], %s1670_s26, %s1670_s26, %s1671_s27  }
  0x45   : > { %s1830_s19 = sadd.s32 1, %s1665_s12   ;;  %s34_s20 = sadd.s32 1, %s1661_s11 }
  0x46   : > { %s31_s22 = ssub.s32 %s1665_s12, %s1830_s19  ;;  %p41_p12 = scmp.ne.s32.totalorder %s1661_s11, %s1657_s10 }
  0x47   : > { %p32_p7 = scmp.eq.s32.totalorder %s31_s22, 0  ;;  %p42_p1 = scmp.eq.s32.totalorder %s1665_s12, 0 }
  0x48   : > { %p1840_p9 = por %p239_p2, %p41_p12  ;;  %p1360_p13 = scmp.lt.s32.totalorder %s1665_s12, 2 }
  0x49   : > { %s1846_s29 = scalar_select %p32_p7, %s1661_s11, %s34_s20  }
  0x4a   : > { %s2000_s28 = scalar_select %p1840_p9, 1, 0 }
  0x4b   : > { %p43_p0 = por %p42_p1, %p41_p12  ;;  %s329_s18 = sand.u32 1, %s1661_s11  }
  0x4c   : > { %s1154_s24 = sshll.u32 %s329_s18, 5  ;;  %s1222_s26 = sshll.u32 %s1665_s12, 9 }
  0x4d   : > { %s1853_s21 = scalar_lea.hbm %s1974_s0, %s1222_s26  ;;  %s333_s22 = scalar_lea.vmem [#allocation2], %s1154_s24 }
  0x4e   : > { %s340_s23 = sshll.u32 %s333_s22, 4  ;;  %p1857_p2 = pnand %p1360_p13, %p43_p0  ;;  %s1855_s23 = int_to_ptr.vmem [resolvable:$true] %s340_s23 }
  0x4f   : > { %s1861_s20 = scalar_lea.sflag [#allocation3], %s329_s18  ;;  %s1565_s1 = scalar_lea.hbm %s1853_s21, 512 }
  0x50   : > { %p1566_p11 = scmp.ne.s32.totalorder %s1853_s21, %s1565_s1  ;;  %p1567_p3 = pneg %p1857_p2 }
  0x51   : > { %s1570_s24 = scalar_lea.hbm %s1974_s0, 1024  ;;  %p1571_p12 = scmp.lt.s32.totalorder %s1853_s21, %s1974_s0 }
  0x52   : > { %p1568_p5 = pnand %p1567_p3, %p1566_p11  ;;  %p1572_p7 = scmp.lt.s32.totalorder %s1570_s24, %s1565_s1 }
  0x54   : > { %p1569_p10 = pneg %p1568_p5  ;;  %p1573_p1 = por %p1572_p7, %p1571_p12 }
  0x56   : > { %p1574_p13 = pnand %p1573_p1, %p1569_p10 }
  0x58   : > { %1577 = shalt.err (!%p1574_p13)
}
  0x59   : > { %s1578_s18 = scalar_lea.vmem %s1855_s23, 512  ;;  %s1675_s3 = smov [#allocation2]  }
  0x5a   : > { %p1579_p0 = scmp.ne.s32.totalorder %s1855_s23, %s1578_s18  ;;  %s1583_s5 = sshll.u32 %s1675_s3, 4  ;;  %s1584_s5 = int_to_ptr.vmem [resolvable:$false] %s1583_s5 }
  0x5b   : > { %s1585_s26 = scalar_lea.vmem %s1584_s5, 1024  ;;  %p1586_p5 = scmp.lt.s32.totalorder %s1855_s23, %s1584_s5 }
  0x5c   : > { %p1581_p6 = pnand %p1579_p0, %p1567_p3  ;;  %p1587_p9 = scmp.lt.s32.totalorder %s1585_s26, %s1578_s18 }
  0x5e   : > { %p1582_p11 = pneg %p1581_p6  ;;  %p1588_p4 = por %p1587_p9, %p1586_p5 }
  0x60   : > { %p1589_p8 = pnand %p1588_p4, %p1582_p11 }
  0x62   : > { %1592 = shalt.err (!%p1589_p8)
}
  0x63   : > { %s2002_s1 = smov 8   ;;  %s2003_s27 = smov 128  }
  0x64   : > { %1351 = dma.hbm_to_vmem [thread:$0]  (!%p1857_p2), %s1853_s21, 512, %s1855_s23, %s1861_s20, %s2003_s27, %s2003_s27, %s2002_s1  }
  0x65   : > { %p2004_p6 = scmp.ne.s32.totalorder %s1995_s17, 0 }
  0x66   : > { %s1888_s3 = sand.u32 (!%p2004_p6), 1, %s1657_s10   ;;  %p2005_p4 = scmp.ne.s32.totalorder (!%p2004_p6), %s1993_s15, 0 }
  0x67   : > { %352 = sbr.rel (%p2004_p6) target bundleno = 975 (0x3cf), region = 56  ;;  %s1158_s5 = sshll.u32 (!%p2004_p6), %s1888_s3, 5 }
  0x68   : > { %s355_s24 = scalar_lea.sflag (!%p2004_p6), [#allocation3], %s1888_s3  ;;  %s1892_s14 = scalar_lea.vmem (!%p2004_p6), [#allocation2], %s1158_s5 }
  0x6c   : > { %1636 = dma.done.wait (%p2005_p4), %s355_s24, 512  }
  0x6d   : > { %1638 = vsyncadd (%p2005_p4), %s355_s24, 4294966784  ;;  %p2006_p8 = scmp.eq.s32.totalorder %s1751_s13, 0 }
  0x6f   : > { %1640 = dma.done.wait (%p2006_p8), [#allocation6], 2560   ;;  %p2007_p9 = pmov %p2006_p8 }
  0x70   : > { %p2008_p2 = pmov %p2006_p8 }
  0x71   : > { %1642 = vsyncadd (%p2007_p9), [#allocation6], 4294964736 }
  0x72   : > { %1644 = dma.done.wait (%p2008_p2), [#allocation9], 3072   ;;  %p2009_p3 = pmov %p2008_p2 }
  0x73   : > { %v1409_v0 = vld [vmem:[#allocation5 + $0x18] sm:$0xff]   ;;  %v1410_v1 = vld [vmem:[#allocation5 + $0x10] sm:$0xff]   ;;  %v1411_v2 = vld [vmem:[#allocation5 + $0x8] sm:$0xff]   ;;  %vm457_vm0 = vcmask 523264   ;;  %v1676_v26 = vmov 0   ;;  %v537_v61 = vlaneseq  ;;  %s1163_s22 = sshll.u32 %s1888_s3, 4 }
  0x74   : > { %1646 = vsyncadd (%p2009_p3), [#allocation9], 4294964224  ;;  %1283 = vmatprep.subr.bf16.mxu0 %v1409_v0  ;;  %v412_v3 = vld [vmem:[%s1892_s14] sm:$0xff]  ;;  %v413_v4 = vld [vmem:[%s1892_s14 + $0x8] sm:$0xff]  ;;  %659 = vmatprep.mubr.bf16.mxu1 %v1676_v26  ;;  %s408_s1 = scalar_lea.vmem [#allocation11], %s1163_s22  ;;  %s1227_s5 = sshll.u32 %s1751_s13, 8 }
  0x75   : > { %1284 = vmatpush3.bf16.msra.mxu0 %v1409_v0  ;;  %v416_v5 = vpack.c.bf16 %v413_v4, %v412_v3  ;;  %v1413_v6 = vld [vmem:[#allocation7 + $0x74] ss:$8 sps:$4 sm:$0xff]   ;;  %v1415_v7 = vld [vmem:[#allocation7 + $0x70] ss:$8 sps:$4 sm:$0xff]   ;;  %v1416_v8 = vld [vmem:[#allocation7 + $0x64] ss:$8 sps:$4 sm:$0xff]   ;;  %s1931_s15 = scalar_lea.hbm %s1983_s9, %s1227_s5 }
  0x76   : > { %1285 = vmatprep.subr.bf16.mxu0 %v1410_v1  ;;  %v1412_v9 = vld [vmem:[#allocation5] sm:$0xff]   ;;  %627 = vmatprep.subr.bf16.mxu1 %v1413_v6  ;;  %v414_v11 = vld [vmem:[%s1892_s14 + $0x10] sm:$0xff]  ;;  %v415_v13 = vld [vmem:[%s1892_s14 + $0x18] sm:$0xff]  ;;  %v538_v62 = vshrl.u32 %v537_v61, 7  ;;  %s1036_s27 = sshll.u32 %s408_s1, 4  ;;  %s1023_s17 = scalar_lea.sflag [#allocation4], %s1888_s3  ;;  %s1926_s27 = int_to_ptr.vmem [resolvable:$true] %s1036_s27 }
  0x77   : > { %1291 = vmatprep.mubr.msk.bf16.mxu0 %vm457_vm0, %v416_v5  ;;  %628 = vmatpush1.bf16.msra.mxu1 %v1415_v7  ;;  %v1418_v10 = vld [vmem:[#allocation7 + $0x60] ss:$8 sps:$4 sm:$0xff]   ;;  %v1419_v12 = vld [vmem:[#allocation7 + $0x54] ss:$8 sps:$4 sm:$0xff]   ;;  %v1421_v14 = vld [vmem:[#allocation7 + $0x50] ss:$8 sps:$4 sm:$0xff]   ;;  %v417_v16 = vpack.c.bf16 %v415_v13, %v414_v11 }
  0x78   : > { %629 = vmatprep.subr.bf16.mxu1 %v1416_v8  ;;  %v1422_v15 = vld [vmem:[#allocation7 + $0x44] ss:$8 sps:$4 sm:$0xff]   ;;  %v1424_v17 = vld [vmem:[#allocation7 + $0x40] ss:$8 sps:$4 sm:$0xff]   ;;  %v1425_v18 = vld [vmem:[#allocation7 + $0x34] ss:$8 sps:$4 sm:$0xff]  }
  0x79   : > { %1286 = vmatpush3.bf16.msra.mxu0 %v1410_v1  ;;  %v1427_v19 = vld [vmem:[#allocation7 + $0x30] ss:$8 sps:$4 sm:$0xff]   ;;  %v1428_v20 = vld [vmem:[#allocation7 + $0x24] ss:$8 sps:$4 sm:$0xff]   ;;  %v1430_v21 = vld [vmem:[#allocation7 + $0x20] ss:$8 sps:$4 sm:$0xff]  }
  0x7a   : > { %1287 = vmatprep.subr.bf16.mxu0 %v1411_v2  ;;  %v1431_v22 = vld [vmem:[#allocation7 + $0x14] ss:$8 sps:$4 sm:$0xff]   ;;  %v1433_v23 = vld [vmem:[#allocation7 + $0x10] ss:$8 sps:$4 sm:$0xff]   ;;  %v1434_v24 = vld [vmem:[#allocation7 + $0x4] ss:$8 sps:$4 sm:$0xff]  }
  0x7b   : > { %630 = vmatpush1.bf16.msra.mxu1 %v1418_v10  ;;  %v1436_v25 = vld [vmem:[#allocation7] ss:$8 sps:$4 sm:$0xff]   ;;  %v1437_v27 = vld [vmem:[#allocation8 + $0x78] sm:$0xff]   ;;  %v1439_v29 = vld [vmem:[#allocation8 + $0x70] sm:$0xff]   ;;  %v543_v63 = vsub.s32 1, %v538_v62  ;;  %v539_v0 = vsub.s32 0, %v538_v62 }
  0x7c   : > { %631 = vmatprep.subr.bf16.mxu1 %v1419_v12  ;;  %v1438_v28 = vld [vmem:[#allocation8 + $0x38] sm:$0xff]   ;;  %v1440_v30 = vld [vmem:[#allocation8 + $0x30] sm:$0xff]   ;;  %v1441_v31 = vld [vmem:[#allocation8 + $0x68] sm:$0xff]   ;;  %s1593_s23 = scalar_lea.vmem %s1926_s27, 256  ;;  %p2010_p12 = scmp.ne.s32.totalorder %s2000_s28, 0 }
  0x7d   : > { %1288 = vmatpush3.bf16.msra.mxu0 %v1411_v2  ;;  %v1442_v32 = vld [vmem:[#allocation8 + $0x28] sm:$0xff]   ;;  %v1443_v33 = vld [vmem:[#allocation8 + $0x60] sm:$0xff]   ;;  %v1445_v35 = vld [vmem:[#allocation8 + $0x58] sm:$0xff]   ;;  %p1594_p10 = scmp.ne.s32.totalorder %s1926_s27, %s1593_s23  ;;  %s1677_s13 = smov [#allocation11]  }
  0x7e   : > { %1289 = vmatprep.subr.bf16.mxu0 %v1412_v9  ;;  %v1444_v34 = vld [vmem:[#allocation8 + $0x20] sm:$0xff]   ;;  %v1446_v36 = vld [vmem:[#allocation8 + $0x18] sm:$0xff]   ;;  %v1447_v52 = vld [vmem:[#allocation8 + $0x50] sm:$0xff]   ;;  %s1597_s25 = sshll.u32 %s1677_s13, 4  ;;  %s1598_s25 = int_to_ptr.vmem [resolvable:$false] %s1597_s25 }
  0x7f   : > { %632 = vmatpush1.bf16.msra.mxu1 %v1421_v14  ;;  %v1164_v39 = vld [vmem:[%s1976_s2] ss:$0 sm:$0xff]  ;;  %v1448_v53 = vld [vmem:[#allocation8 + $0x10] sm:$0xff]   ;;  %v1449_v54 = vld [vmem:[#allocation8 + $0x48] sm:$0xff]   ;;  %p1595_p7 = pnand %p1594_p10, %p2010_p12  ;;  %s1599_s21 = scalar_lea.vmem %s1598_s25, 512 }
  0x80   : > { %633 = vmatprep.subr.bf16.mxu1 %v1422_v15  ;;  %v1450_v55 = vld [vmem:[#allocation8 + $0x8] sm:$0xff]   ;;  %v1451_v56 = vld [vmem:[#allocation8 + $0x40] sm:$0xff]   ;;  %v1453_v58 = vld [vmem:[#allocation10 + $0x38] sm:$0xff]   ;;  %p1600_p13 = scmp.lt.s32.totalorder %s1926_s27, %s1598_s25  ;;  %p1601_p0 = scmp.lt.s32.totalorder %s1599_s21, %s1593_s23 }
  0x81   : > { %1290 = vmatpush3.bf16.msra.mxu0 %v1412_v9  ;;  %v1452_v57 = vld [vmem:[#allocation8] sm:$0xff]   ;;  %v1454_v59 = vld [vmem:[#allocation10 + $0x30] sm:$0xff]   ;;  %v1455_v60 = vld [vmem:[#allocation10 + $0x28] sm:$0xff]   ;;  %p1596_p1 = pneg %p1595_p7 }
  0x82   : > { %1245 = vmatprep.subr.bf16.mxu0 %v1437_v27  ;;  %v535_v1 = vld [vmem:[%s1978_s4] sm:$0x3]  ;;  %p1602_p11 = por %p1601_p0, %p1600_p13 }
  0x83   : > { %634 = vmatpush1.bf16.msra.mxu1 %v1424_v17  ;;  %v544_v3 = vrot.slane %v535_v1, %v543_v63  ;;  %v540_v4 = vrot.slane %v535_v1, %v539_v0  ;;  %v1204_v61 = vld [vmem:[%s1982_s8] ss:$0 sm:$0xff] }
  0x84   : > { %1292 = vmatmul.mubr.msk.bf16.vlgmr.msra.gmra.mxu0 %vm457_vm0, %v417_v16  ;;  %635 = vmatprep.subr.bf16.mxu1 %v1425_v18  ;;  %p1603_p5 = pnand %p1602_p11, %p1596_p1 }
  0x85   : > { %1246 = vmatpush3.bf16.msra.mxu0 %v1438_v28 }
  0x86   : > { %1247 = vmatprep.subr.bf16.mxu0 %v1439_v29 }
  0x87   : > { %636 = vmatpush1.bf16.msra.mxu1 %v1427_v19 }
  0x88   : > { %637 = vmatprep.subr.bf16.mxu1 %v1428_v20 }
  0x89   : > { %1248 = vmatpush3.bf16.msra.mxu0 %v1440_v30 }
  0x8a   : > { %1249 = vmatprep.subr.bf16.mxu0 %v1441_v31 }
  0x8b   : > { %638 = vmatpush1.bf16.msra.mxu1 %v1430_v21 }
  0x8c   : > { %639 = vmatprep.subr.bf16.mxu1 %v1431_v22 }
  0x8d   : > { %1250 = vmatpush3.bf16.msra.mxu0 %v1442_v32  ;;  %v1456_v32 = vld [vmem:[#allocation10 + $0x20] sm:$0xff]  }
  0x8e   : > { %1251 = vmatprep.subr.bf16.mxu0 %v1443_v33  ;;  %v1457_v33 = vld [vmem:[#allocation10 + $0x18] sm:$0xff]  }
  0x8f   : > { %640 = vmatpush1.bf16.msra.mxu1 %v1433_v23 }
  0x90   : > { %641 = vmatprep.subr.bf16.mxu1 %v1434_v24 }
  0x91   : > { %1252 = vmatpush3.bf16.msra.mxu0 %v1444_v34  ;;  %v1458_v34 = vld [vmem:[#allocation10 + $0x10] sm:$0xff]  }
  0x92   : > { %1253 = vmatprep.subr.bf16.mxu0 %v1445_v35  ;;  %v1459_v35 = vld [vmem:[#allocation10 + $0x8] sm:$0xff]  }
  0x93   : > { %642 = vmatpush1.bf16.msra.mxu1 %v1436_v25 }
  0x94   : > { %1295 = vmatprep.subr.bf16.mxu1 %v1453_v58 }
  0x95   : > { %1254 = vmatpush3.bf16.msra.mxu0 %v1446_v36  ;;  %v1460_v36 = vld [vmem:[#allocation10] sm:$0xff]  }
  0x96   : > { %1255 = vmatprep.subr.bf16.mxu0 %v1447_v52 }
  0x99   : > { %1256 = vmatpush3.bf16.msra.mxu0 %v1448_v53 }
  0x9a   : > { %1257 = vmatprep.subr.bf16.mxu0 %v1449_v54 }
  0x9d   : > { %1258 = vmatpush3.bf16.msra.mxu0 %v1450_v55 }
  0x9e   : > { %1259 = vmatprep.subr.bf16.mxu0 %v1451_v56 }
  0xa1   : > { %1260 = vmatpush3.bf16.msra.mxu0 %v1452_v57 }
 0x144   : > { %v1293_v37 = vpop.f32.mrf.mxu0 }
 0x145   : > { %v507_v48 = vadd.f32 %v1293_v37, %v1164_v39 }
 0x146   : > { %v498_v38 = vpop.f32.mrf.mxu0 }
 0x147   : > { %v499_v41 = vadd.f32 %v1164_v39, %v498_v38  ;;  %v515_v50 = vmax.f32 %v507_v48, 0.0 }
 0x148   : > { %v1294_v40 = vpop.f32.mrf.mxu0 }
 0x149   : > { %v513_v44 = vmax.f32 %v499_v41, 0.0  ;;  %v510_v46 = vadd.f32 %v1294_v40, %v1164_v39  ;;  %v1187_v40 = vld [vmem:[%s1980_s6] ss:$0 sm:$0xff] }
 0x14a   : > { %v501_v42 = vpop.f32.mrf.mxu0 }
 0x14b   : > { %v502_v43 = vadd.f32 %v1164_v39, %v501_v42  ;;  %v516_v49 = vmax.f32 %v510_v46, 0.0 }
 0x14d   : > { %v514_v45 = vmax.f32 %v502_v43, 0.0  ;;  %v518_v51 = vpack.c.bf16 %v516_v49, %v515_v50 }
 0x14f   : > { %v517_v47 = vpack.c.bf16 %v514_v45, %v513_v44 }
 0x151   : > { %660 = vmatmul.mubr.bf16.vlgmr.msra.gmra.mxu1 %v517_v47 }
 0x152   : > { %669 = vmatprep.mubr.bf16.mxu1 %v1676_v26  ;;  %1296 = vmatpush3.bf16.msra.mxu1 %v1453_v58 }
 0x153   : > { %1297 = vmatprep.subr.bf16.mxu1 %v1454_v59 }
 0x156   : > { %1298 = vmatpush3.bf16.msra.mxu1 %v1454_v59 }
 0x157   : > { %1299 = vmatprep.subr.bf16.mxu1 %v1455_v60 }
 0x159   : > { %670 = vmatmul.mubr.bf16.gmra.mxu1 %v518_v51 }
 0x15a   : > { %1300 = vmatpush3.bf16.msra.mxu1 %v1455_v60 }
 0x15b   : > { %1301 = vmatprep.subr.bf16.mxu1 %v1456_v32 }
 0x15e   : > { %1302 = vmatpush3.bf16.msra.mxu1 %v1456_v32 }
 0x15f   : > { %1303 = vmatprep.subr.bf16.mxu1 %v1457_v33 }
 0x162   : > { %1304 = vmatpush3.bf16.msra.mxu1 %v1457_v33 }
 0x163   : > { %1305 = vmatprep.subr.bf16.mxu1 %v1458_v34 }
 0x166   : > { %1306 = vmatpush3.bf16.msra.mxu1 %v1458_v34 }
 0x167   : > { %1307 = vmatprep.subr.bf16.mxu1 %v1459_v35 }
 0x16a   : > { %1308 = vmatpush3.bf16.msra.mxu1 %v1459_v35 }
 0x16b   : > { %1309 = vmatprep.subr.bf16.mxu1 %v1460_v36 }
 0x16e   : > { %1310 = vmatpush3.bf16.msra.mxu1 %v1460_v36 }
 0x211   : > { %v661_v2 = vpop.f32.mrf.mxu1 }
 0x212   : > { %v662_v9 = vadd.f32 %v661_v2, %v540_v4 }
 0x213   : > { %v663_v5 = vpop.f32.mrf.mxu1 }
 0x214   : > { %v664_v7 = vadd.f32 %v663_v5, %v544_v3  ;;  %v680_v16 = vmax.f32 %v662_v9, 0.0 }
 0x215   : > { %v665_v6 = vpop.f32.mrf.mxu1 }
 0x216   : > { %v666_v8 = vadd.f32 %v665_v6, %v540_v4  ;;  %v681_v14 = vmax.f32 %v664_v7, 0.0 }
 0x217   : > { %v667_v10 = vpop.f32.mrf.mxu1 }
 0x218   : > { %v668_v11 = vadd.f32 %v667_v10, %v544_v3  ;;  %v682_v12 = vmax.f32 %v666_v8, 0.0 }
 0x219   : > { %v671_v13 = vpop.f32.mrf.mxu1 }
 0x21a   : > { %v683_v15 = vmax.f32 %v668_v11, 0.0  ;;  %v688_v19 = vpack.c.bf16 %v682_v12, %v680_v16  ;;  %v672_v23 = vadd.f32 %v671_v13, %v540_v4 }
 0x21b   : > { %v673_v17 = vpop.f32.mrf.mxu1 }
 0x21c   : > { %v689_v18 = vpack.c.bf16 %v683_v15, %v681_v14  ;;  %v674_v21 = vadd.f32 %v673_v17, %v544_v3  ;;  %v684_v29 = vmax.f32 %v672_v23, 0.0 }
 0x21d   : > { %v675_v20 = vpop.f32.mrf.mxu1 }
 0x21e   : > { %v676_v22 = vadd.f32 %v675_v20, %v540_v4  ;;  %859 = vmatprep.mubr.bf16.mxu0 %v689_v18  ;;  %v685_v27 = vmax.f32 %v674_v21, 0.0 }
 0x21f   : > { %v677_v24 = vpop.f32.mrf.mxu1  ;;  %860 = vmatmul.mubr.bf16.vlgmr.msra.gmra.mxu0 %v688_v19 }
 0x220   : > { %v678_v25 = vadd.f32 %v677_v24, %v544_v3  ;;  %v686_v26 = vmax.f32 %v676_v22, 0.0 }
 0x222   : > { %v687_v28 = vmax.f32 %v678_v25, 0.0  ;;  %v690_v31 = vpack.c.bf16 %v686_v26, %v684_v29 }
 0x224   : > { %v691_v30 = vpack.c.bf16 %v687_v28, %v685_v27 }
 0x226   : > { %867 = vmatprep.mubr.bf16.mxu0 %v691_v30 }
 0x227   : > { %868 = vmatmul.mubr.bf16.gmra.mxu0 %v690_v31 }
 0x2df   : > { %v1261_v37 = vpop.f32.mrf.mxu0 }
 0x2e1   : > { %v1262_v38 = vpop.f32.mrf.mxu0 }
 0x2e2   : > { %v1263_v39 = vadd.f32 %v1262_v38, %v1261_v37 }
 0x2e3   : > { %v1264_v41 = vpop.f32.mrf.mxu0 }
 0x2e4   : > { %v862_v43 = vadd.f32 %v1263_v39, %v1187_v40 }
 0x2e5   : > { %v1265_v42 = vpop.f32.mrf.mxu0 }
 0x2e6   : > { %v1266_v44 = vadd.f32 %v1265_v42, %v1264_v41  ;;  %v876_v48 = vmax.f32 %v862_v43, 0.0 }
 0x2e7   : > { %v1267_v45 = vpop.f32.mrf.mxu0 }
 0x2e8   : > { %v865_v46 = vadd.f32 %v1266_v44, %v1187_v40 }
 0x2e9   : > { %v1268_v47 = vpop.f32.mrf.mxu0 }
 0x2ea   : > { %v877_v49 = vmax.f32 %v865_v46, 0.0  ;;  %v1269_v50 = vadd.f32 %v1268_v47, %v1267_v45 }
 0x2eb   : > { %v1270_v51 = vpop.f32.mrf.mxu0 }
 0x2ec   : > { %v880_v52 = vpack.c.bf16 %v877_v49, %v876_v48  ;;  %v870_v54 = vadd.f32 %v1269_v50, %v1187_v40 }
 0x2ed   : > { %v1271_v53 = vpop.f32.mrf.mxu0 }
 0x2ee   : > { %v1272_v55 = vadd.f32 %v1271_v53, %v1270_v51  ;;  %1311 = vmatprep.mubr.bf16.mxu1 %v880_v52  ;;  %v878_v57 = vmax.f32 %v870_v54, 0.0 }
 0x2f0   : > { %v873_v56 = vadd.f32 %v1272_v55, %v1187_v40 }
 0x2f2   : > { %v879_v58 = vmax.f32 %v873_v56, 0.0 }
 0x2f4   : > { %v881_v59 = vpack.c.bf16 %v879_v58, %v878_v57 }
 0x2f6   : > { %1312 = vmatmul.mubr.bf16.vlgmr.msra.gmra.mxu1 %v881_v59 }
 0x3b6   : > { %v1313_v60 = vpop.f32.mrf.mxu1 }
 0x3b7   : > { %v996_v0 = vadd.f32 %v1313_v60, %v1204_v61 }
 0x3b8   : > { %v987_v62 = vpop.f32.mrf.mxu1 }
 0x3b9   : > { %v988_v3 = vadd.f32 %v1204_v61, %v987_v62 }
 0x3ba   : > { %v1314_v63 = vpop.f32.mrf.mxu1 }
 0x3bb   : > { %v999_v1 = vadd.f32 %v1314_v63, %v1204_v61 }
 0x3bc   : > { %v990_v2 = vpop.f32.mrf.mxu1 }
 0x3bd   : > { %v1236_v4 = vpack.c.bf16 %v999_v1, %v996_v0  ;;  %v991_v5 = vadd.f32 %v1204_v61, %v990_v2 }
 0x3bf   : > { %1238 = vst [vmem:[%s408_s1 + $0x8] sm:$0xff] %v1236_v4   ;;  %v1231_v6 = vpack.c.bf16 %v991_v5, %v988_v3 }
 0x3c1   : > { %1232 = vst [vmem:[%s408_s1] sm:$0xff] %v1231_v6  }
 0x3c2   : > { %1606 = shalt.err (!%p1603_p5)
}
 0x3c3   : > { %s1607_s20 = scalar_lea.hbm %s1931_s15, 256  ;;  %s1611_s26 = scalar_lea.hbm %s1983_s9, 512 }
 0x3c4   : > { %p1608_p6 = scmp.ne.s32.totalorder %s1931_s15, %s1607_s20  ;;  %p1612_p9 = scmp.lt.s32.totalorder %s1931_s15, %s1983_s9 }
 0x3c5   : > { %p1613_p2 = scmp.lt.s32.totalorder %s1611_s26, %s1607_s20 }
 0x3c6   : > { %p1609_p4 = pnand %p1608_p6, %p2010_p12 }
 0x3c7   : > { %p1614_p3 = por %p1613_p2, %p1612_p9 }
 0x3c8   : > { %p1610_p8 = pneg %p1609_p4 }
 0x3ca   : > { %p1615_p10 = pnand %p1614_p3, %p1610_p8 }
 0x3cc   : > { %1618 = shalt.err (!%p1615_p10)
}
 0x3cd   : > { %s1678_s24 = smov 64   ;;  %s1679_s14 = smov 4  }
 0x3ce   : > { %1333 = dma.vmem_to_hbm [thread:$0]  (%p2010_p12), %s1926_s27, 256, %s1931_s15, %s1023_s17, %s1678_s24, %s1678_s24, %s1679_s14  }
 0x3cf PF: > { %s1051_s23 = sand.u32 1, %s1653_s30   ;;  %p2011_p7 = scmp.ne.s32.totalorder %s1994_s16, 0 }
 0x3d0   : > { %p2012_p1 = scmp.ge.s32.totalorder %s1665_s12, 2  ;;  %s1052_s13 = scalar_lea.sflag [#allocation4], %s1051_s23 }
 0x3d2   : > { %p1353_p13 = pnand %p2012_p1, %p2011_p7 }
 0x3d4   : > { %p1354_p0 = pneg %p1353_p13 }
 0x3d6   : > { %1648 = dma.done.wait (%p1354_p0), %s1052_s13, 256  }
 0x3d7   : > { %1650 = vsyncadd (%p1354_p0), %s1052_s13, 4294967040  ;;  %p24_p11 = scmp.ge.s32.totalorder %s1830_s19, 4   ;;  %s2013_s30 = smov %s1657_s10 }
 0x3d8   : > { %s2014_s10 = smov %s1661_s11  ;;  %s2015_s11 = smov %s1846_s29 }
 0x3d9   : > { %s2016_s12 = smov %s1830_s19  ;;  %26 = sbr.rel (!%p24_p11) target bundleno = 11 (0xb), region = 117 }
 0x3de   :  { %1057 = vsyncpa [#allocation3], 1 }
 0x3df   :  { %1059 = vsyncpa [#allocation3 + $0x1], 1 }
 0x3e0   :  { %1060 = vsyncpa [#allocation6], 1 }
 0x3e1   :  { %1061 = vsyncpa [#allocation9], 1 }
 0x3e2   :  { %1062 = vsyncpa [#allocation4], 1 }
 0x3e3   :  { %1064 = vsyncpa [#allocation4 + $0x1], 1 }

</bundles_post_ra>
